<compile_context>
chip_gen: v7x
topology: tpu7x:2x2x1
jax: 0.10.0
libtpu: 0.0.40
codegen_flags: <defaults>
</compile_context>

<pallas_src>
import math
import functools

import jax
import jax.numpy as jnp
from jax import lax
from jax.experimental import pallas as pl
from jax.experimental.pallas import tpu as pltpu


def _gelu_exact(x):
    # torch.nn.GELU() default = exact (erf) formulation; math kept in f32.
    return 0.5 * x * (1.0 + lax.erf(x * (1.0 / math.sqrt(2.0))))


def _round_up(a, b):
    return (a + b - 1) // b * b


def _ffn_kernel(x_ref, w1_ref, b1_ref, w2_ref, b2_ref, o_ref, *scratch,
                compute_dtype, acc_in_out):
    # x_ref:  (tm, D)     native x dtype
    # w1_ref: (tmid, D)   native W1 dtype (PyTorch fc1.weight, row chunk j)
    # b1_ref: (1, tmid)   f32
    # w2_ref: (D, tmid)   native W2 dtype (PyTorch fc2.weight, col chunk j)
    # b2_ref: (1, D)      f32
    # o_ref:  (tm, D)     output dtype
    # scratch: optional (tm, D) f32 accumulator (only when out dtype != f32)
    j = pl.program_id(1)
    acc_ref = o_ref if acc_in_out else scratch[0]

    @pl.when(j == 0)
    def _():
        acc_ref[...] = jnp.zeros_like(acc_ref)

    x = x_ref[...].astype(compute_dtype)
    w1c = w1_ref[...].astype(compute_dtype)
    # fc1 chunk: x @ W1_chunk^T  (contract on d_model) -> (tm, tmid), f32 accumulate.
    h = lax.dot_general(x, w1c, (((1,), (1,)), ((), ())),
                        preferred_element_type=jnp.float32)
    h = _gelu_exact(h + b1_ref[...])       # exact erf GELU in f32
    # Dropout is identity at inference time.
    # TODO(synk): training-mode dropout (p=0.1) is not implemented in-kernel.

    w2c = w2_ref[...].astype(compute_dtype)
    # fc2 chunk: h @ W2_chunk^T  (contract on the mid chunk) -> (tm, D), f32 acc.
    acc_ref[...] += lax.dot_general(h.astype(compute_dtype), w2c,
                                    (((1,), (1,)), ((), ())),
                                    preferred_element_type=jnp.float32)

    @pl.when(j == pl.num_programs(1) - 1)
    def _():
        o_ref[...] = (acc_ref[...] + b2_ref[...]).astype(o_ref.dtype)


def _chip_info():
    kind = ""
    try:
        kind = jax.devices()[0].device_kind.lower()
    except Exception:
        pass
    is_v5 = "v5" in kind
    is_v7 = "v7" in kind
    try:
        vmem_cap = int(pltpu.get_tpu_info().vmem_capacity_bytes)
    except Exception:
        vmem_cap = (64 if is_v7 else 128) * 1024 * 1024
    return is_v5, is_v7, vmem_cap


def _tile_bytes(tm_e, tmid_e, D, x_isz, w_isz, c_isz, o_isz, use_scratch):
    b = 0
    b += 2 * tm_e * D * x_isz            # x tile (double-buffered)
    b += 2 * tmid_e * D * w_isz          # W1 chunk
    b += 2 * D * tmid_e * w_isz          # W2 chunk
    b += 2 * 8 * tmid_e * 4              # b1 chunk (sublane-padded)
    b += 2 * 8 * D * 4                   # b2
    b += 2 * tm_e * D * o_isz            # out tile (real out dtype)
    if use_scratch:
        b += tm_e * D * 4                # f32 accumulator scratch
    # in-kernel temporaries (single copies)
    if x_isz != c_isz:
        b += tm_e * D * c_isz            # x cast to compute dtype
    if w_isz != c_isz:
        b += 2 * tmid_e * D * c_isz      # W1/W2 chunk casts
    b += tm_e * tmid_e * 4               # f32 GELU intermediate
    if c_isz != 4:
        b += tm_e * tmid_e * c_isz       # compute-dtype copy fed to fc2
    return b


@functools.partial(jax.jit,
                   static_argnames=("tm_eff", "tmid_eff", "compute_dtype",
                                    "vmem_budget"))
def _feed_forward_impl(x, w1, b1, w2, b2, *, tm_eff, tmid_eff, compute_dtype,
                       vmem_budget):
    B, S, D = x.shape
    mid = w1.shape[0]
    M = B * S
    out_dtype = jnp.dtype(x.dtype)
    acc_in_out = out_dtype == jnp.float32

    M_pad = _round_up(M, tm_eff)
    mid_pad = _round_up(mid, tmid_eff)

    xf = x.reshape(M, D)
    if M_pad != M:
        xf = jnp.pad(xf, ((0, M_pad - M), (0, 0)))

    # Weights stay in PyTorch nn.Linear layout; pad only when mid is ragged.
    # (zero W1 rows -> gelu(0 + 0) = 0; zero W2 cols -> zero contribution)
    w1p, w2p = w1, w2
    b1r = b1.astype(jnp.float32).reshape(1, mid)
    if mid_pad != mid:
        w1p = jnp.pad(w1, ((0, mid_pad - mid), (0, 0)))
        w2p = jnp.pad(w2, ((0, 0), (0, mid_pad - mid)))
        b1r = jnp.pad(b1r, ((0, 0), (0, mid_pad - mid)))
    b2r = b2.astype(jnp.float32).reshape(1, D)

    grid = (M_pad // tm_eff, mid_pad // tmid_eff)

    x_isz = jnp.dtype(x.dtype).itemsize
    w_isz = jnp.dtype(w1.dtype).itemsize
    c_isz = jnp.dtype(compute_dtype).itemsize
    o_isz = out_dtype.itemsize
    tile_bytes = _tile_bytes(tm_eff, tmid_eff, D, x_isz, w_isz, c_isz, o_isz,
                             not acc_in_out)
    vmem_limit = int(min(vmem_budget,
                         max(int(tile_bytes * 1.25), 32 * 1024 * 1024)))

    n_row_tiles = grid[0]
    cost = pl.CostEstimate(
        flops=4 * M * D * mid,
        transcendentals=M * mid,
        bytes_accessed=int(M_pad * D * (x_isz + o_isz)
                           + n_row_tiles * mid_pad * D * 2 * w_isz
                           + n_row_tiles * (mid_pad + D) * 4),
    )

    kernel = functools.partial(_ffn_kernel, compute_dtype=compute_dtype,
                               acc_in_out=acc_in_out)
    scratch_shapes = (() if acc_in_out
                      else (pltpu.VMEM((tm_eff, D), jnp.float32),))

    out = pl.pallas_call(
        kernel,
        out_shape=jax.ShapeDtypeStruct((M_pad, D), out_dtype),
        grid_spec=pltpu.PrefetchScalarGridSpec(
            num_scalar_prefetch=0,
            grid=grid,
            in_specs=[
                pl.BlockSpec((tm_eff, D), lambda i, j: (i, 0)),      # x rows
                pl.BlockSpec((tmid_eff, D), lambda i, j: (j, 0)),    # W1 row chunk
                pl.BlockSpec((1, tmid_eff), lambda i, j: (0, j)),    # b1 chunk
                pl.BlockSpec((D, tmid_eff), lambda i, j: (0, j)),    # W2 col chunk
                pl.BlockSpec((1, D), lambda i, j: (0, 0)),           # b2
            ],
            out_specs=pl.BlockSpec((tm_eff, D), lambda i, j: (i, 0)),
            scratch_shapes=scratch_shapes,
        ),
        compiler_params=pltpu.CompilerParams(
            dimension_semantics=("parallel", "arbitrary"),
            vmem_limit_bytes=vmem_limit,
        ),
        cost_estimate=cost,
    )(xf, w1p, b1r, w2p, b2r)

    return out[:M].reshape(B, S, D)


def feed_forward(x, w1, b1, w2, b2, *, tm=None, tmid=None,
                 compute_dtype=jnp.bfloat16):
    """x: [B, S, d_model]; w1: [middle, d_model]; b1: [middle];
    w2: [d_model, middle]; b2: [d_model]  (PyTorch nn.Linear layout — no
    pre-transpose needed).  compute_dtype feeds the MXU (default bf16);
    accumulation and GELU are always f32.  Output dtype == x.dtype."""
    B, S, D = x.shape
    mid = w1.shape[0]
    M = B * S
    compute_dtype = jnp.dtype(compute_dtype)
    out_dtype = jnp.dtype(x.dtype)

    is_v5, is_v7, vmem_cap = _chip_info()
    m_gran = 128 if is_v5 else 256
    m_min = 16 if (compute_dtype.itemsize < 4 or out_dtype.itemsize < 4) else 8
    if tm is None:
        tm = 512 if is_v5 else 1024
    if tmid is None:
        tmid = 512 if (is_v5 or is_v7) else 1024
    tm = _round_up(max(tm, m_min), m_gran)
    tmid = _round_up(max(tmid, 128), 128)

    # Row tile: clamp to the problem, then MXU-granularity rounding.
    if M >= m_gran:
        tm_eff = min(tm, _round_up(M, m_gran))
    else:
        tm_eff = _round_up(max(M, 1), m_min)
    # v7x: make sure both TensorCores get at least one row tile.
    if is_v7 and M >= 2 * m_gran:
        tm_eff = min(tm_eff, _round_up((M + 1) // 2, m_gran))

    tmid_eff = min(tmid, _round_up(mid, 128))

    # VMEM budget: leave headroom below physical VMEM for compiler scratch.
    budget = max(int(vmem_cap * 0.75), vmem_cap - 16 * 1024 * 1024)
    x_isz = jnp.dtype(x.dtype).itemsize
    w_isz = jnp.dtype(w1.dtype).itemsize
    c_isz = compute_dtype.itemsize
    o_isz = out_dtype.itemsize
    use_scratch = out_dtype != jnp.float32
    while _tile_bytes(tm_eff, tmid_eff, D, x_isz, w_isz, c_isz, o_isz,
                      use_scratch) > budget:
        if tmid_eff > 256:
            tmid_eff = max(128, _round_up(tmid_eff // 2, 128))
        elif tm_eff > m_gran:
            tm_eff = max(m_gran, _round_up(tm_eff // 2, m_min))
        else:
            break

    return _feed_forward_impl(x, w1, b1, w2, b2,
                              tm_eff=int(tm_eff), tmid_eff=int(tmid_eff),
                              compute_dtype=compute_dtype,
                              vmem_budget=int(budget))


if __name__ == "__main__":
    # Small shapes consistent with the module: batch=2, seq=8, d_model=32, middle=64
    B, S, D, MID = 2, 8, 32, 64
    key = jax.random.PRNGKey(0)
    kx, kw1, kb1, kw2, kb2 = jax.random.split(key, 5)

    x = jax.random.normal(kx, (B, S, D), dtype=jnp.float32)

    # PyTorch Linear init: U(-1/sqrt(fan_in), 1/sqrt(fan_in))
    lim1 = 1.0 / math.sqrt(D)
    lim2 = 1.0 / math.sqrt(MID)
    w1 = jax.random.uniform(kw1, (MID, D), minval=-lim1, maxval=lim1, dtype=jnp.float32)
    b1 = jax.random.uniform(kb1, (MID,), minval=-lim1, maxval=lim1, dtype=jnp.float32)
    w2 = jax.random.uniform(kw2, (D, MID), minval=-lim2, maxval=lim2, dtype=jnp.float32)
    b2 = jax.random.uniform(kb2, (D,), minval=-lim2, maxval=lim2, dtype=jnp.float32)

    # Pure-JAX reference (dropout identity at inference)
    ref = jax.nn.gelu(x @ w1.T + b1, approximate=False) @ w2.T + b2

    # 1) f32 MXU path: exact check (also exercises accumulate-into-output path)
    out = feed_forward(x, w1, b1, w2, b2, compute_dtype=jnp.float32)
    out = jax.block_until_ready(out)
    assert out.shape == (B, S, D)
    assert jnp.allclose(out, ref, atol=1e-4, rtol=1e-4)

    # 2) default bf16-MXU path (f32 accumulation / f32 GELU): loose check
    out_bf16 = feed_forward(x, w1, b1, w2, b2)
    out_bf16 = jax.block_until_ready(out_bf16)
    assert jnp.allclose(out_bf16, ref, atol=8e-2, rtol=8e-2)

    # 3) bf16 activations in / bf16 out: exercises the f32-scratch accumulator path
    out_act16 = feed_forward(x.astype(jnp.bfloat16), w1, b1, w2, b2)
    out_act16 = jax.block_until_ready(out_act16)
    assert out_act16.dtype == jnp.bfloat16
    assert jnp.allclose(out_act16.astype(jnp.float32), ref, atol=1.5e-1, rtol=1e-1)

    print("KERNEL_OK")
</pallas_src>

<mosaic_0001>
module attributes {stable_mosaic.version = 11 : i64} {
  func.func @_ffn_kernel(%arg0: i32, %arg1: i32, %arg2: memref<16x32xf32, #tpu.memory_space<vmem>>, %arg3: memref<128x32xf32, #tpu.memory_space<vmem>>, %arg4: memref<1x128xf32, #tpu.memory_space<vmem>>, %arg5: memref<32x128xf32, #tpu.memory_space<vmem>>, %arg6: memref<1x32xf32, #tpu.memory_space<vmem>>, %arg7: memref<16x32xf32, #tpu.memory_space<vmem>>) attributes {dimension_semantics = [#tpu.dimension_semantics<parallel>, #tpu.dimension_semantics<arbitrary>], iteration_bounds = array<i64: 1, 1>, scalar_prefetch = 0 : i64, scratch_operands = 0 : i64, tpu.core_type = #tpu.core_type<tc>, window_params = [{transform_indices = @transform_0, window_bounds = array<i64: 16, 32>}, {transform_indices = @transform_1, window_bounds = array<i64: 128, 32>}, {transform_indices = @transform_2, window_bounds = array<i64: 1, 128>}, {transform_indices = @transform_3, window_bounds = array<i64: 32, 128>}, {pipeline_mode = #tpu.pipeline_mode<synchronous>, transform_indices = @transform_4, window_bounds = array<i64: 1, 32>}, {transform_indices = @transform_5, window_bounds = array<i64: 16, 32>}]} {
    %c0_i32 = arith.constant 0 : i32
    %0 = arith.cmpi eq, %arg1, %c0_i32 : i32
    %1 = arith.extui %0 : i1 to i32
    %c0_i32_0 = arith.constant 0 : i32
    %2 = arith.cmpi ne, %1, %c0_i32_0 : i32
    scf.if %2 {
      %cst_18 = arith.constant 0.000000e+00 : f32
      %25 = vector.broadcast %cst_18 : f32 to vector<16x32xf32>
      %c0_19 = arith.constant 0 : index
      %c0_20 = arith.constant 0 : index
      %26 = vector.load %arg7[%c0_19, %c0_20] : memref<16x32xf32, #tpu.memory_space<vmem>>, vector<16x32xf32>
      tpu.vector_store %arg7[%c0_19, %c0_20], %25 {strides = array<i32>} : memref<16x32xf32, #tpu.memory_space<vmem>>, vector<16x32xf32>,
    } else {
    }
    %c0 = arith.constant 0 : index
    %c0_1 = arith.constant 0 : index
    %3 = vector.load %arg2[%c0, %c0_1] : memref<16x32xf32, #tpu.memory_space<vmem>>, vector<16x32xf32>
    %c0_2 = arith.constant 0 : index
    %c0_3 = arith.constant 0 : index
    %4 = vector.load %arg3[%c0_2, %c0_3] : memref<128x32xf32, #tpu.memory_space<vmem>>, vector<128x32xf32>
    %cst = arith.constant dense<0.000000e+00> : vector<16x128xf32>
    %5 = tpu.matmul %3, %4, %cst {dimension_numbers = #tpu.dot_dimension_numbers<[1], [1], [0], [0], [0, 0, 1, 0], [], []>} : vector<16x32xf32>, vector<128x32xf32>, vector<16x128xf32> -> vector<16x128xf32>
    %c0_4 = arith.constant 0 : index
    %c0_5 = arith.constant 0 : index
    %6 = vector.load %arg4[%c0_4, %c0_5] : memref<1x128xf32, #tpu.memory_space<vmem>>, vector<1x128xf32>
    %7 = vector.broadcast %6 : vector<1x128xf32> to vector<16x128xf32>
    %8 = arith.addf %5, %7 : vector<16x128xf32>
    %cst_6 = arith.constant 5.000000e-01 : f32
    %9 = vector.broadcast %cst_6 : f32 to vector<16x128xf32>
    %10 = arith.mulf %9, %8 : vector<16x128xf32>
    %cst_7 = arith.constant 0.707106769 : f32
    %11 = vector.broadcast %cst_7 : f32 to vector<16x128xf32>
    %12 = arith.mulf %8, %11 : vector<16x128xf32>
    %13 = math.erf %12 : vector<16x128xf32>
    %cst_8 = arith.constant 1.000000e+00 : f32
    %14 = vector.broadcast %cst_8 : f32 to vector<16x128xf32>
    %15 = arith.addf %14, %13 : vector<16x128xf32>
    %16 = arith.mulf %10, %15 : vector<16x128xf32>
    %c0_9 = arith.constant 0 : index
    %c0_10 = arith.constant 0 : index
    %17 = vector.load %arg5[%c0_9, %c0_10] : memref<32x128xf32, #tpu.memory_space<vmem>>, vector<32x128xf32>
    %c0_11 = arith.constant 0 : index
    %c0_12 = arith.constant 0 : index
    %18 = vector.load %arg7[%c0_11, %c0_12] : memref<16x32xf32, #tpu.memory_space<vmem>>, vector<16x32xf32>
    %cst_13 = arith.constant dense<0.000000e+00> : vector<16x32xf32>
    %19 = tpu.matmul %16, %17, %cst_13 {dimension_numbers = #tpu.dot_dimension_numbers<[1], [1], [0], [0], [0, 0, 1, 0], [], []>} : vector<16x128xf32>, vector<32x128xf32>, vector<16x32xf32> -> vector<16x32xf32>
    %20 = arith.addf %18, %19 : vector<16x32xf32>
    %c0_14 = arith.constant 0 : index
    %c0_15 = arith.constant 0 : index
    %21 = vector.load %arg7[%c0_14, %c0_15] : memref<16x32xf32, #tpu.memory_space<vmem>>, vector<16x32xf32>
    tpu.vector_store %arg7[%c0_14, %c0_15], %20 {strides = array<i32>} : memref<16x32xf32, #tpu.memory_space<vmem>>, vector<16x32xf32>,
    %c0_i32_16 = arith.constant 0 : i32
    %22 = arith.cmpi eq, %arg1, %c0_i32_16 : i32
    %23 = arith.extui %22 : i1 to i32
    %c0_i32_17 = arith.constant 0 : i32
    %24 = arith.cmpi ne, %23, %c0_i32_17 : i32
    scf.if %24 {
      %c0_18 = arith.constant 0 : index
      %c0_19 = arith.constant 0 : index
      %25 = vector.load %arg7[%c0_18, %c0_19] : memref<16x32xf32, #tpu.memory_space<vmem>>, vector<16x32xf32>
      %c0_20 = arith.constant 0 : index
      %c0_21 = arith.constant 0 : index
      %26 = vector.load %arg6[%c0_20, %c0_21] : memref<1x32xf32, #tpu.memory_space<vmem>>, vector<1x32xf32>
      %27 = vector.broadcast %26 : vector<1x32xf32> to vector<16x32xf32>
      %28 = arith.addf %25, %27 : vector<16x32xf32>
      %c0_22 = arith.constant 0 : index
      %c0_23 = arith.constant 0 : index
      %29 = vector.load %arg7[%c0_22, %c0_23] : memref<16x32xf32, #tpu.memory_space<vmem>>, vector<16x32xf32>
      tpu.vector_store %arg7[%c0_22, %c0_23], %28 {strides = array<i32>} : memref<16x32xf32, #tpu.memory_space<vmem>>, vector<16x32xf32>,
    } else {
    }
    return
  }
  func.func @transform_0(%arg0: i32, %arg1: i32) -> (i32, i32) {
    %c0_i32 = arith.constant 0 : i32
    %c0_i32_0 = arith.constant 0 : i32
    return %arg0, %c0_i32 : i32, i32
  }
  func.func @transform_1(%arg0: i32, %arg1: i32) -> (i32, i32) {
    %c0_i32 = arith.constant 0 : i32
    %c0_i32_0 = arith.constant 0 : i32
    return %arg1, %c0_i32 : i32, i32
  }
  func.func @transform_2(%arg0: i32, %arg1: i32) -> (i32, i32) {
    %c0_i32 = arith.constant 0 : i32
    %c0_i32_0 = arith.constant 0 : i32
    return %c0_i32, %arg1 : i32, i32
  }
  func.func @transform_3(%arg0: i32, %arg1: i32) -> (i32, i32) {
    %c0_i32 = arith.constant 0 : i32
    %c0_i32_0 = arith.constant 0 : i32
    return %c0_i32, %arg1 : i32, i32
  }
  func.func @transform_4(%arg0: i32, %arg1: i32) -> (i32, i32) {
    %c0_i32 = arith.constant 0 : i32
    %c0_i32_0 = arith.constant 0 : i32
    %c0_i32_1 = arith.constant 0 : i32
    return %c0_i32, %c0_i32_0 : i32, i32
  }
  func.func @transform_5(%arg0: i32, %arg1: i32) -> (i32, i32) {
    %c0_i32 = arith.constant 0 : i32
    %c0_i32_0 = arith.constant 0 : i32
    return %arg0, %c0_i32 : i32, i32
  }
}

</mosaic_0001>

<bundles_post_ra>
// kernel: _feed_forward_impl.1
= control target key start
LH: loop header
LB: loop body
LE: loop exit
PB: predicated region body
PF: predicated region fallthrough
CT: control target
= control target key end

     0   :  { %vm25_vm0 = vcmask 261120   ;;  %s652_s0 = inlined_call_operand.vmem [shape: f32[16,32], index: 0, kind: input, shape index: {}]   ;;  %s653_s1 = inlined_call_operand.vmem [shape: f32[128,32], index: 1, kind: input, shape index: {}]   ;;  %s654_s2 = inlined_call_operand.vmem [shape: f32[1,128], index: 2, kind: input, shape index: {}]   ;;  %s655_s3 = inlined_call_operand.vmem [shape: f32[32,128], index: 3, kind: input, shape index: {}]   ;;  %s656_s4 = inlined_call_operand.vmem [shape: f32[1,32], index: 4, kind: input, shape index: {}]   ;;  %s657_s5 = inlined_call_operand.hbm [shape: f32[16,32], index: 5, kind: output, shape index: {}]  }
   0x1   :  { %v30_v0 = vld [vmem:[%s653_s1] sm:$0xff]  ;;  %v31_v1 = vld [vmem:[%s653_s1 + $0x8] sm:$0xff]  ;;  %v32_v2 = vld [vmem:[%s653_s1 + $0x10] sm:$0xff] }
   0x2   :  { %v400_v3 = vpack.c.bf16 %v31_v1, %v30_v0  ;;  %vm533_vm1 = vmpackc.low %vm25_vm0, %vm25_vm0  ;;  %v33_v5 = vld [vmem:[%s653_s1 + $0x18] sm:$0xff]  ;;  %v28_v7 = vld [vmem:[%s652_s0] sm:$0xff] }
   0x3   :  { %v406_v6 = vpack.c.bf16 %v33_v5, %v32_v2  ;;  %v34_v8 = vld [vmem:[%s653_s1 + $0x20] sm:$0xff]  ;;  %v35_v9 = vld [vmem:[%s653_s1 + $0x28] sm:$0xff]  ;;  %386 = vmatprep.mubr.msk.f32.mxu0 %vm25_vm0, %v28_v7 }
   0x4   :  { %402 = vmatprep.subr.msk.bf16.mxu0 %vm533_vm1, %v400_v3 }
   0x5   :  { %405 = vmatpush3.bf16.xpose.msk.msra.mxu0 %vm533_vm1, %v400_v3 }
   0x6   :  { %408 = vmatprep.subr.msk.bf16.mxu0 %vm533_vm1, %v406_v6 }
   0x7   :  { %10 = vsyncpa [#allocation3], 0  ;;  %v412_v10 = vpack.c.bf16 %v35_v9, %v34_v8  ;;  %v36_v11 = vld [vmem:[%s653_s1 + $0x30] sm:$0xff]  ;;  %v37_v12 = vld [vmem:[%s653_s1 + $0x38] sm:$0xff]  ;;  %v488_v33 = vmov 0.0   ;;  %s489_s12 = smov [#allocation2]  }
   0x8   :  { %v418_v13 = vpack.c.bf16 %v37_v12, %v36_v11  ;;  %v38_v14 = vld [vmem:[%s653_s1 + $0x40] sm:$0xff]  ;;  %v39_v15 = vld [vmem:[%s653_s1 + $0x48] sm:$0xff]  ;;  %v40_v17 = vld [vmem:[%s653_s1 + $0x50] sm:$0xff]  ;;  %27 = vst.msk [vmem:[#allocation2 + $0x8] sm:$0xff] %vm25_vm0, %v488_v33  ;;  %s299_s13 = sshll.u32 %s489_s12, 4  ;;  %s300_s13 = int_to_ptr.vmem [resolvable:$true] %s299_s13 }
   0x9   :  { %v424_v16 = vpack.c.bf16 %v39_v15, %v38_v14  ;;  %v41_v18 = vld [vmem:[%s653_s1 + $0x58] sm:$0xff]  ;;  %v42_v20 = vld [vmem:[%s653_s1 + $0x60] sm:$0xff]  ;;  %v43_v21 = vld [vmem:[%s653_s1 + $0x68] sm:$0xff]  ;;  %26 = vst.msk [vmem:[#allocation2] sm:$0xff] %vm25_vm0, %v488_v33  ;;  %s464_s14 = scalar_lea.vmem %s300_s13, 256  ;;  %p469_p1 = scmp.lt.s32.totalorder %s300_s13, %s300_s13 }
   0xa   :  { %v430_v19 = vpack.c.bf16 %v41_v18, %v40_v17  ;;  %v436_v22 = vpack.c.bf16 %v43_v21, %v42_v20  ;;  %v44_v23 = vld [vmem:[%s653_s1 + $0x70] sm:$0xff]  ;;  %v45_v24 = vld [vmem:[%s653_s1 + $0x78] sm:$0xff]  ;;  %v29_v26 = vld [vmem:[%s652_s0 + $0x8] sm:$0xff]  ;;  %p465_p0 = scmp.ne.s32.totalorder %s300_s13, %s464_s14  ;;  %p470_p2 = scmp.lt.s32.totalorder %s464_s14, %s464_s14 }
   0xb   :  { %v442_v25 = vpack.c.bf16 %v45_v24, %v44_v23  ;;  %v193_v27 = vld [vmem:[%s655_s3] sm:$0xff]  ;;  %v194_v28 = vld [vmem:[%s655_s3 + $0x8] sm:$0xff]  ;;  %v195_v30 = vld [vmem:[%s655_s3 + $0x10] sm:$0xff] }
   0xc   :  { %v448_v29 = vpack.c.bf16 %v194_v28, %v193_v27  ;;  %v196_v31 = vld [vmem:[%s655_s3 + $0x18] sm:$0xff]  ;;  %v310_v34 = vld [vmem:[%s654_s2] ss:$0 sm:$0xff]  ;;  %p471_p3 = por %p470_p2, %p469_p1 }
   0xd   :  { %411 = vmatpush3.bf16.xpose.msk.msra.mxu0 %vm533_vm1, %v406_v6  ;;  %v452_v32 = vpack.c.bf16 %v196_v31, %v195_v30  ;;  %v329_v55 = vld [vmem:[%s656_s4] ss:$0 sm:$0xff] }
   0xe   :  { %414 = vmatprep.subr.msk.bf16.mxu0 %vm533_vm1, %v412_v10  ;;  %449 = vmatprep.subr.bf16.mxu1 %v448_v29  ;;  %p472_p4 = pnand %p471_p3, %p465_p0 }
   0xf   :  { %451 = vmatpush3.bf16.xpose.msra.mxu1 %v448_v29  ;;  %v198_v49 = vld [vmem:[#allocation2 + $0x8] sm:$0xff] }
  0x10   :  { %453 = vmatprep.subr.bf16.mxu1 %v452_v32  ;;  %v197_v50 = vld [vmem:[#allocation2] sm:$0xff] }
  0x15   :  { %417 = vmatpush3.bf16.xpose.msk.msra.mxu0 %vm533_vm1, %v412_v10 }
  0x16   :  { %420 = vmatprep.subr.msk.bf16.mxu0 %vm533_vm1, %v418_v13 }
  0x17   :  { %455 = vmatpush3.bf16.xpose.msra.mxu1 %v452_v32 }
  0x1d   :  { %423 = vmatpush3.bf16.xpose.msk.msra.mxu0 %vm533_vm1, %v418_v13 }
  0x1e   :  { %426 = vmatprep.subr.msk.bf16.mxu0 %vm533_vm1, %v424_v16 }
  0x25   :  { %429 = vmatpush3.bf16.xpose.msk.msra.mxu0 %vm533_vm1, %v424_v16 }
  0x26   :  { %432 = vmatprep.subr.msk.bf16.mxu0 %vm533_vm1, %v430_v19 }
  0x2d   :  { %435 = vmatpush3.bf16.xpose.msk.msra.mxu0 %vm533_vm1, %v430_v19 }
  0x2e   :  { %438 = vmatprep.subr.msk.bf16.mxu0 %vm533_vm1, %v436_v22 }
  0x35   :  { %441 = vmatpush3.bf16.xpose.msk.msra.mxu0 %vm533_vm1, %v436_v22 }
  0x36   :  { %444 = vmatprep.subr.msk.bf16.mxu0 %vm533_vm1, %v442_v25 }
  0x3d   :  { %447 = vmatpush3.bf16.xpose.msk.msra.mxu0 %vm533_vm1, %v442_v25 }
  0x44   :  { %387 = vmatmul.mubr.msk.f32.vlgmr.msra.gmra.mrb[0].mxu0 %vm25_vm0, %v29_v26 }
 0x117   :  { %v388_v35 = vpop.f32.mrb[0].mxu0 }
 0x118   :  { %v180_v36 = vadd.f32 %v388_v35, %v310_v34  ;;  %v174_v37 = vpop.f32.mrb[1].mxu0 }
 0x119   :  { %v175_v38 = vadd.f32 %v310_v34, %v174_v37 }
 0x11a   :  { %v186_v39 = vmul.f32 0.70710677, %v180_v36  ;;  %v184_v46 = vmul.f32 0.5, %v180_v36 }
 0x11b   :  { %v185_v40 = vmul.f32 0.70710677, %v175_v38  ;;  %v183_v44 = vmul.f32 0.5, %v175_v38 }
 0x11c   :  { %460 = verf.f32 %v186_v39 }
 0x11d   :  { %462 = verf.f32 %v185_v40 }
 0x126   :  { %v461_v41 = vpop.eup %460 }
 0x127   :  { %v463_v42 = vpop.eup %462  ;;  %v190_v43 = vadd.f32 1.0, %v461_v41 }
 0x128   :  { %v189_v45 = vadd.f32 1.0, %v463_v42 }
 0x129   :  { %v192_v48 = vmul.f32 %v190_v43, %v184_v46 }
 0x12a   :  { %v191_v47 = vmul.f32 %v189_v45, %v183_v44 }
 0x12c   :  { %397 = vmatprep.mubr.f32.mxu1 %v191_v47 }
 0x12d   :  { %398 = vmatmul.mubr.f32.vlgmr.msra.gmra.mrb[0].mxu1 %v192_v48 }
 0x200   :  { %v399_v51 = vpop.f32.mrb[0].mxu1 }
 0x201   :  { %v275_v52 = vadd.f32 %v399_v51, %v198_v49  ;;  %v265_v53 = vpop.f32.mrb[1].mxu1 }
 0x202   :  { %v274_v54 = vadd.f32 %v265_v53, %v197_v50 }
 0x203   :  { %277 = vst.msk [vmem:[#allocation2 + $0x8] sm:$0xff] %vm25_vm0, %v275_v52 }
 0x204   :  { %276 = vst.msk [vmem:[#allocation2] sm:$0xff] %vm25_vm0, %v274_v54 }
 0x20a   :  { %v282_v56 = vld [vmem:[#allocation2 + $0x8] sm:$0xff] }
 0x20b   :  { %v281_v57 = vld [vmem:[#allocation2] sm:$0xff]  ;;  %v291_v58 = vadd.f32 %v329_v55, %v282_v56 }
 0x20c   :  { %v290_v59 = vadd.f32 %v329_v55, %v281_v57 }
 0x20d   :  { %293 = vst.msk [vmem:[#allocation2 + $0x8] sm:$0xff] %vm25_vm0, %v291_v58 }
 0x20e   :  { %292 = vst.msk [vmem:[#allocation2] sm:$0xff] %vm25_vm0, %v290_v59 }
 0x20f   :  { %475 = shalt.err (!%p472_p4)
}
 0x210   :  { %s476_s16 = scalar_lea.hbm %s657_s5, 256 }
 0x211   :  { %p477_p5 = scmp.ne.s32.totalorder %s657_s5, %s476_s16  ;;  %p480_p6 = scmp.lt.u32.totalorder %s476_s16, %s657_s5 }
 0x213   :  { %p482_p7 = pnand %p480_p6, %p477_p5 }
 0x215   :  { %485 = shalt.err (!%p482_p7)
}
 0x216   :  { %s490_s21 = smov 128   ;;  %s491_s22 = smov 8  }
 0x217   :  { %305 = dma.vmem_to_hbm [thread:$0]  %s300_s13, 256, %s657_s5, [#allocation3], %s490_s21, %s490_s21, %s491_s22  }
 0x218   :  { %486 = dma.done.wait [#allocation3], 256  }
 0x219   :  { %487 = vsyncadd [#allocation3], 4294967040 }
 0x21a   :  { %309 = vsyncpa [#allocation3], 1 }

</bundles_post_ra>
